<compile_context>
chip_gen: v7x
topology: tpu7x:2x2x1
jax: 0.10.0
libtpu: 0.0.40
codegen_flags: <defaults>
</compile_context>

<pallas_src>
import functools

import jax
import jax.numpy as jnp
from jax.experimental import pallas as pl
from jax.experimental.pallas import tpu as pltpu


def _round_up(x, m):
    return (x + m - 1) // m * m


def _dice_partial_kernel(logits_ref, target_ref, inter_ref, denom_ref, *,
                         hw, tile, steps_per_half):
    # logits_ref: (N, C, T) native dtype in VMEM (T = lane tile, multiple of 128)
    # target_ref: (N, T)    int8/uint8/int32 in VMEM
    # inter_ref / denom_ref: (1, N, C) f32 output blocks = per-half partial sums,
    #                        accumulated in place across the tile (i) axis.
    h = pl.program_id(0)            # which half of HW ("parallel" -> per TC on v7x)
    i = pl.program_id(1)            # tile index within the half ("arbitrary")

    @pl.when(i == 0)
    def _init():
        inter_ref[...] = jnp.zeros_like(inter_ref)
        denom_ref[...] = jnp.zeros_like(denom_ref)

    gidx = h * steps_per_half + i   # global (unclamped) tile index

    # Load native dtype, upcast to f32 on the VPU (keeps HBM traffic minimal).
    logits = logits_ref[...].astype(jnp.float32)          # (N, C, T)
    tgt = target_ref[...].astype(jnp.int32)               # (N, T)
    n, c, t = logits.shape

    # --- per-pixel softmax over the class (sublane) axis ---
    m = jnp.max(logits, axis=1, keepdims=True)
    e = jnp.exp(logits - m)
    s = jnp.sum(e, axis=1, keepdims=True)                 # (N, 1, T)
    prob = e * pl.reciprocal(s, approx=True)              # one recip per pixel

    # --- fused one-hot via broadcast compare (no (N,C,T) iota materialized) ---
    class_ids = jax.lax.broadcasted_iota(jnp.int32, (1, c, 1), 1)
    onehot = (tgt[:, None, :] == class_ids).astype(jnp.float32)   # (N, C, T)

    def _accum(p, oh):
        inter_ref[...] += jnp.sum(p * oh, axis=2)[None]   # intersection
        denom_ref[...] += jnp.sum(p + oh, axis=2)[None]   # psum + tsum fused

    full_blocks = hw // tile          # number of tiles with no OOB lanes (static)
    total_blocks = 2 * steps_per_half

    if total_blocks * tile == hw:
        # Every grid tile is full: no masking anywhere (static fast path).
        _accum(prob, onehot)
    else:
        @pl.when(gidx < full_blocks)
        def _full_tile():
            _accum(prob, onehot)

        @pl.when(gidx >= full_blocks)
        def _edge_tile():
            # Remainder tile (or a fully-redundant clamped tile): OOB block data
            # is garbage, so mask BOTH prob and one-hot with a select (a select,
            # not a multiply, so garbage NaNs cannot propagate).
            lane = jax.lax.broadcasted_iota(jnp.int32, (1, 1, t), 2)
            valid = (gidx * tile + lane) < hw
            _accum(jnp.where(valid, prob, 0.0), jnp.where(valid, onehot, 0.0))


def _choose_tile(hw, n, c, logits_itemsize, target_itemsize, tile_hw):
    if tile_hw is not None:
        return int(max(128, _round_up(int(tile_hw), 128)))
    # Double-buffered input bytes per lane; budget is conservative across
    # v5e/v6e (128 MiB VMEM) and v7x (64 MiB per TC, 2 TCs).
    bytes_per_lane = 2 * (n * c * logits_itemsize + n * target_itemsize)
    budget = 24 * 1024 * 1024
    tile = (budget // bytes_per_lane) // 128 * 128
    return int(max(128, min(tile, 8192, _round_up(hw, 128))))


@functools.partial(jax.jit, static_argnames=("num_classes", "tile_hw"))
def multi_class_dice_loss(logits, target, num_classes, tile_hw=None):
    """logits: (N, C, H, W) float (f32/bf16); target: (N, H, W) int class ids."""
    N, C, H, W = logits.shape
    assert C == num_classes
    HW = H * W

    logits_r = logits.reshape(N, C, HW)                    # free reshape, native dtype
    if target.dtype not in (jnp.int8, jnp.uint8, jnp.int32):
        target = target.astype(jnp.int32)
    target_r = target.reshape(N, HW)                       # stream native int dtype

    tile = _choose_tile(HW, N, C, jnp.dtype(logits_r.dtype).itemsize,
                        jnp.dtype(target_r.dtype).itemsize, tile_hw)
    n_blocks = (HW + tile - 1) // tile
    steps_per_half = (n_blocks + 1) // 2                   # leading parallel axis of 2
    last_block = n_blocks - 1

    kernel = functools.partial(_dice_partial_kernel, hw=HW, tile=tile,
                               steps_per_half=steps_per_half)

    def lane_block(h, i):
        # Clamp so any redundant trailing tile stays in bounds; its contribution
        # is masked to zero inside the kernel (using the unclamped index).
        return jnp.minimum(h * steps_per_half + i, last_block)

    cost = pl.CostEstimate(
        flops=12 * N * C * HW,
        transcendentals=N * C * HW + N * HW,
        bytes_accessed=(N * C * HW * jnp.dtype(logits_r.dtype).itemsize
                        + N * HW * jnp.dtype(target_r.dtype).itemsize
                        + 2 * 2 * N * C * 4),
    )

    inter, denom = pl.pallas_call(
        kernel,
        out_shape=(jax.ShapeDtypeStruct((2, N, C), jnp.float32),
                   jax.ShapeDtypeStruct((2, N, C), jnp.float32)),
        grid_spec=pltpu.PrefetchScalarGridSpec(
            num_scalar_prefetch=0,
            grid=(2, steps_per_half),
            in_specs=[
                pl.BlockSpec((N, C, tile), lambda h, i: (0, 0, lane_block(h, i))),
                pl.BlockSpec((N, tile), lambda h, i: (0, lane_block(h, i))),
            ],
            out_specs=(
                pl.BlockSpec((1, N, C), lambda h, i: (h, 0, 0)),
                pl.BlockSpec((1, N, C), lambda h, i: (h, 0, 0)),
            ),
        ),
        compiler_params=pltpu.CompilerParams(
            dimension_semantics=("parallel", "arbitrary"),  # halves || ; HW tiles = reduction
            vmem_limit_bytes=32 * 1024 * 1024,              # safe on v5e/v6e/v7x
        ),
        cost_estimate=cost,
    )(logits_r, target_r)

    # Tiny (2, N, C) combine in plain JAX (PyTorch module semantics, smooth=1).
    inter = jnp.sum(inter, axis=0)                          # (N, C)
    denom = jnp.sum(denom, axis=0)                          # (N, C)
    smooth = jnp.float32(1.0)
    dice = 2.0 * (inter + smooth) / (denom + smooth)        # (N, C)
    per_class = 1.0 - jnp.sum(dice, axis=0) / jnp.float32(N)
    return jnp.sum(per_class)


def _reference(logits, target, num_classes):
    # Pure-JAX reference mirroring the PyTorch code, for verification.
    N = logits.shape[0]
    prob = jax.nn.softmax(logits.astype(jnp.float32), axis=1)        # (N,C,H,W)
    oh = jax.nn.one_hot(target, num_classes, dtype=jnp.float32)      # (N,H,W,C)
    oh = jnp.transpose(oh, (0, 3, 1, 2))                             # (N,C,H,W)
    total = jnp.float32(0.0)
    for i in range(num_classes):
        p = prob[:, i].reshape(N, -1)
        t = oh[:, i].reshape(N, -1)
        inter = jnp.sum(p * t, axis=1)
        loss = 2.0 * (inter + 1.0) / (jnp.sum(p, axis=1) + jnp.sum(t, axis=1) + 1.0)
        total = total + (1.0 - jnp.sum(loss) / N)
    return total


if __name__ == "__main__":
    key = jax.random.PRNGKey(0)
    num_classes = 4
    # Approx EUP reciprocal in the softmax normalization adds a tiny error to
    # the loss scalar; tolerance reflects that (real bugs are orders larger).
    TOL = dict(rtol=2e-3, atol=2e-3)
    k1, k2, k3, k4, k5, k6 = jax.random.split(key, 6)

    # --- test 1: small f32 case, single full tile (auto tile size) ---
    N, H, W = 2, 16, 16
    logits = jax.random.normal(k1, (N, num_classes, H, W), jnp.float32)
    target = jax.random.randint(k2, (N, H, W), 0, num_classes, jnp.int32)
    loss = jax.block_until_ready(multi_class_dice_loss(logits, target, num_classes))
    ref = jax.block_until_ready(_reference(logits, target, num_classes))
    assert jnp.allclose(loss, ref, **TOL), (loss, ref)

    # --- test 2: bf16 logits, forced small tile -> multi-tile grid + remainder tile ---
    N2, H2, W2 = 2, 48, 48     # HW = 2304 = 4*512 + 256 remainder
    logits2 = jax.random.normal(k3, (N2, num_classes, H2, W2), jnp.float32).astype(jnp.bfloat16)
    target2 = jax.random.randint(k4, (N2, H2, W2), 0, num_classes, jnp.int32)
    loss2 = jax.block_until_ready(
        multi_class_dice_loss(logits2, target2, num_classes, tile_hw=512))
    ref2 = jax.block_until_ready(
        _reference(logits2.astype(jnp.float32), target2, num_classes))
    assert jnp.allclose(loss2, ref2, **TOL), (loss2, ref2)

    # --- test 3: HW not a multiple of 128 (in-kernel OOB-lane masking) + int8 target ---
    N3, H3, W3 = 2, 10, 10     # HW = 100 < 128
    logits3 = jax.random.normal(k5, (N3, num_classes, H3, W3), jnp.float32)
    target3 = jax.random.randint(k6, (N3, H3, W3), 0, num_classes, jnp.int32).astype(jnp.int8)
    loss3 = jax.block_until_ready(multi_class_dice_loss(logits3, target3, num_classes))
    ref3 = jax.block_until_ready(
        _reference(logits3, target3.astype(jnp.int32), num_classes))
    assert jnp.allclose(loss3, ref3, **TOL), (loss3, ref3)

    print("KERNEL_OK")
</pallas_src>

<mosaic_0001>
module attributes {stable_mosaic.version = 11 : i64} {
  func.func @_dice_partial_kernel(%arg0: i32, %arg1: i32, %arg2: memref<2x4x256xf32, #tpu.memory_space<vmem>>, %arg3: memref<2x256xi32, #tpu.memory_space<vmem>>, %arg4: memref<1x2x4xf32, #tpu.memory_space<vmem>>, %arg5: memref<1x2x4xf32, #tpu.memory_space<vmem>>) attributes {dimension_semantics = [#tpu.dimension_semantics<parallel>, #tpu.dimension_semantics<arbitrary>], iteration_bounds = array<i64: 2, 1>, scalar_prefetch = 0 : i64, scratch_operands = 0 : i64, tpu.core_type = #tpu.core_type<tc>, window_params = [{transform_indices = @transform_0, window_bounds = array<i64: 2, 4, 256>}, {transform_indices = @transform_1, window_bounds = array<i64: 2, 256>}, {transform_indices = @transform_2, window_bounds = array<i64: 1, 2, 4>}, {transform_indices = @transform_3, window_bounds = array<i64: 1, 2, 4>}]} {
    %c0_i32 = arith.constant 0 : i32
    %0 = arith.cmpi eq, %arg1, %c0_i32 : i32
    %1 = arith.extui %0 : i1 to i32
    %c0_i32_0 = arith.constant 0 : i32
    %2 = arith.cmpi ne, %1, %c0_i32_0 : i32
    scf.if %2 {
      %cst_10 = arith.constant 0.000000e+00 : f32
      %30 = vector.broadcast %cst_10 : f32 to vector<1x2x4xf32>
      %c0_11 = arith.constant 0 : index
      %c0_12 = arith.constant 0 : index
      %c0_13 = arith.constant 0 : index
      %31 = vector.load %arg4[%c0_11, %c0_12, %c0_13] : memref<1x2x4xf32, #tpu.memory_space<vmem>>, vector<1x2x4xf32>
      tpu.vector_store %arg4[%c0_11, %c0_12, %c0_13], %30 {strides = array<i32>} : memref<1x2x4xf32, #tpu.memory_space<vmem>>, vector<1x2x4xf32>,
      %cst_14 = arith.constant 0.000000e+00 : f32
      %32 = vector.broadcast %cst_14 : f32 to vector<1x2x4xf32>
      %c0_15 = arith.constant 0 : index
      %c0_16 = arith.constant 0 : index
      %c0_17 = arith.constant 0 : index
      %33 = vector.load %arg5[%c0_15, %c0_16, %c0_17] : memref<1x2x4xf32, #tpu.memory_space<vmem>>, vector<1x2x4xf32>
      tpu.vector_store %arg5[%c0_15, %c0_16, %c0_17], %32 {strides = array<i32>} : memref<1x2x4xf32, #tpu.memory_space<vmem>>, vector<1x2x4xf32>,
    } else {
    }
    %c1_i32 = arith.constant 1 : i32
    %3 = arith.muli %arg0, %c1_i32 : i32
    %4 = arith.addi %3, %arg1 : i32
    %c0 = arith.constant 0 : index
    %c0_1 = arith.constant 0 : index
    %c0_2 = arith.constant 0 : index
    %5 = vector.load %arg2[%c0, %c0_1, %c0_2] : memref<2x4x256xf32, #tpu.memory_space<vmem>>, vector<2x4x256xf32>
    %c0_3 = arith.constant 0 : index
    %c0_4 = arith.constant 0 : index
    %6 = vector.load %arg3[%c0_3, %c0_4] : memref<2x256xi32, #tpu.memory_space<vmem>>, vector<2x256xi32>
    %cst = arith.constant dense<0xFF800000> : vector<2x256xf32>
    %7 = vector.multi_reduction <maximumf>, %5, %cst [1] : vector<2x4x256xf32> to vector<2x256xf32>
    %8 = vector.shape_cast %7 : vector<2x256xf32> to vector<2x1x256xf32>
    %9 = vector.broadcast %8 : vector<2x1x256xf32> to vector<2x4x256xf32>
    %10 = arith.subf %5, %9 : vector<2x4x256xf32>
    %11 = math.exp %10 : vector<2x4x256xf32>
    %cst_5 = arith.constant dense<0.000000e+00> : vector<2x256xf32>
    %12 = vector.multi_reduction <add>, %11, %cst_5 [1] : vector<2x4x256xf32> to vector<2x256xf32>
    %13 = vector.shape_cast %12 : vector<2x256xf32> to vector<2x1x256xf32>
    %14 = tpu.reciprocal %13 {approx = true} : vector<2x1x256xf32> -> vector<2x1x256xf32>
    %15 = vector.broadcast %14 : vector<2x1x256xf32> to vector<2x4x256xf32>
    %16 = arith.mulf %11, %15 : vector<2x4x256xf32>
    %17 = tpu.iota {dimensions = array<i32: 1>} : vector<1x4x1xi32>
    %18 = vector.shape_cast %6 : vector<2x256xi32> to vector<2x1x256xi32>
    %19 = vector.broadcast %18 : vector<2x1x256xi32> to vector<2x4x256xi32>
    %20 = vector.broadcast %17 : vector<1x4x1xi32> to vector<2x4x256xi32>
    %21 = arith.cmpi eq, %19, %20 : vector<2x4x256xi32>
    %22 = arith.extui %21 : vector<2x4x256xi1> to vector<2x4x256xi32>
    %23 = arith.sitofp %22 : vector<2x4x256xi32> to vector<2x4x256xf32>
    %c1_i32_6 = arith.constant 1 : i32
    %24 = arith.cmpi slt, %4, %c1_i32_6 : i32
    %25 = arith.extui %24 : i1 to i32
    %c0_i32_7 = arith.constant 0 : i32
    %26 = arith.cmpi ne, %25, %c0_i32_7 : i32
    scf.if %26 {
      %c0_10 = arith.constant 0 : index
      %c0_11 = arith.constant 0 : index
      %c0_12 = arith.constant 0 : index
      %30 = vector.load %arg4[%c0_10, %c0_11, %c0_12] : memref<1x2x4xf32, #tpu.memory_space<vmem>>, vector<1x2x4xf32>
      %31 = arith.mulf %16, %23 : vector<2x4x256xf32>
      %cst_13 = arith.constant dense<0.000000e+00> : vector<2x4xf32>
      %32 = vector.multi_reduction <add>, %31, %cst_13 [2] : vector<2x4x256xf32> to vector<2x4xf32>
      %33 = vector.shape_cast %32 : vector<2x4xf32> to vector<1x2x4xf32>
      %34 = arith.addf %30, %33 : vector<1x2x4xf32>
      %c0_14 = arith.constant 0 : index
      %c0_15 = arith.constant 0 : index
      %c0_16 = arith.constant 0 : index
      %35 = vector.load %arg4[%c0_14, %c0_15, %c0_16] : memref<1x2x4xf32, #tpu.memory_space<vmem>>, vector<1x2x4xf32>
      tpu.vector_store %arg4[%c0_14, %c0_15, %c0_16], %34 {strides = array<i32>} : memref<1x2x4xf32, #tpu.memory_space<vmem>>, vector<1x2x4xf32>,
      %c0_17 = arith.constant 0 : index
      %c0_18 = arith.constant 0 : index
      %c0_19 = arith.constant 0 : index
      %36 = vector.load %arg5[%c0_17, %c0_18, %c0_19] : memref<1x2x4xf32, #tpu.memory_space<vmem>>, vector<1x2x4xf32>
      %37 = arith.addf %16, %23 : vector<2x4x256xf32>
      %cst_20 = arith.constant dense<0.000000e+00> : vector<2x4xf32>
      %38 = vector.multi_reduction <add>, %37, %cst_20 [2] : vector<2x4x256xf32> to vector<2x4xf32>
      %39 = vector.shape_cast %38 : vector<2x4xf32> to vector<1x2x4xf32>
      %40 = arith.addf %36, %39 : vector<1x2x4xf32>
      %c0_21 = arith.constant 0 : index
      %c0_22 = arith.constant 0 : index
      %c0_23 = arith.constant 0 : index
      %41 = vector.load %arg5[%c0_21, %c0_22, %c0_23] : memref<1x2x4xf32, #tpu.memory_space<vmem>>, vector<1x2x4xf32>
      tpu.vector_store %arg5[%c0_21, %c0_22, %c0_23], %40 {strides = array<i32>} : memref<1x2x4xf32, #tpu.memory_space<vmem>>, vector<1x2x4xf32>,
    } else {
    }
    %c1_i32_8 = arith.constant 1 : i32
    %27 = arith.cmpi sge, %4, %c1_i32_8 : i32
    %28 = arith.extui %27 : i1 to i32
    %c0_i32_9 = arith.constant 0 : i32
    %29 = arith.cmpi ne, %28, %c0_i32_9 : i32
    scf.if %29 {
      %30 = tpu.iota {dimensions = array<i32: 2>} : vector<1x1x256xi32>
      %c256_i32 = arith.constant 256 : i32
      %31 = arith.muli %4, %c256_i32 : i32
      %32 = vector.broadcast %31 : i32 to vector<1x1x256xi32>
      %33 = arith.addi %32, %30 : vector<1x1x256xi32>
      %c256_i32_10 = arith.constant 256 : i32
      %34 = vector.broadcast %c256_i32_10 : i32 to vector<1x1x256xi32>
      %35 = arith.cmpi slt, %33, %34 : vector<1x1x256xi32>
      %cst_11 = arith.constant 0.000000e+00 : f32
      %36 = vector.shape_cast %35 : vector<1x1x256xi1> to vector<1x1x256xi1>
      %37 = vector.broadcast %36 : vector<1x1x256xi1> to vector<2x4x256xi1>
      %38 = vector.broadcast %cst_11 : f32 to vector<2x4x256xf32>
      %39 = arith.select %37, %16, %38 : vector<2x4x256xi1>, vector<2x4x256xf32>
      %cst_12 = arith.constant 0.000000e+00 : f32
      %40 = vector.shape_cast %35 : vector<1x1x256xi1> to vector<1x1x256xi1>
      %41 = vector.broadcast %40 : vector<1x1x256xi1> to vector<2x4x256xi1>
      %42 = vector.broadcast %cst_12 : f32 to vector<2x4x256xf32>
      %43 = arith.select %41, %23, %42 : vector<2x4x256xi1>, vector<2x4x256xf32>
      %c0_13 = arith.constant 0 : index
      %c0_14 = arith.constant 0 : index
      %c0_15 = arith.constant 0 : index
      %44 = vector.load %arg4[%c0_13, %c0_14, %c0_15] : memref<1x2x4xf32, #tpu.memory_space<vmem>>, vector<1x2x4xf32>
      %45 = arith.mulf %39, %43 : vector<2x4x256xf32>
      %cst_16 = arith.constant dense<0.000000e+00> : vector<2x4xf32>
      %46 = vector.multi_reduction <add>, %45, %cst_16 [2] : vector<2x4x256xf32> to vector<2x4xf32>
      %47 = vector.shape_cast %46 : vector<2x4xf32> to vector<1x2x4xf32>
      %48 = arith.addf %44, %47 : vector<1x2x4xf32>
      %c0_17 = arith.constant 0 : index
      %c0_18 = arith.constant 0 : index
      %c0_19 = arith.constant 0 : index
      %49 = vector.load %arg4[%c0_17, %c0_18, %c0_19] : memref<1x2x4xf32, #tpu.memory_space<vmem>>, vector<1x2x4xf32>
      tpu.vector_store %arg4[%c0_17, %c0_18, %c0_19], %48 {strides = array<i32>} : memref<1x2x4xf32, #tpu.memory_space<vmem>>, vector<1x2x4xf32>,
      %c0_20 = arith.constant 0 : index
      %c0_21 = arith.constant 0 : index
      %c0_22 = arith.constant 0 : index
      %50 = vector.load %arg5[%c0_20, %c0_21, %c0_22] : memref<1x2x4xf32, #tpu.memory_space<vmem>>, vector<1x2x4xf32>
      %51 = arith.addf %39, %43 : vector<2x4x256xf32>
      %cst_23 = arith.constant dense<0.000000e+00> : vector<2x4xf32>
      %52 = vector.multi_reduction <add>, %51, %cst_23 [2] : vector<2x4x256xf32> to vector<2x4xf32>
      %53 = vector.shape_cast %52 : vector<2x4xf32> to vector<1x2x4xf32>
      %54 = arith.addf %50, %53 : vector<1x2x4xf32>
      %c0_24 = arith.constant 0 : index
      %c0_25 = arith.constant 0 : index
      %c0_26 = arith.constant 0 : index
      %55 = vector.load %arg5[%c0_24, %c0_25, %c0_26] : memref<1x2x4xf32, #tpu.memory_space<vmem>>, vector<1x2x4xf32>
      tpu.vector_store %arg5[%c0_24, %c0_25, %c0_26], %54 {strides = array<i32>} : memref<1x2x4xf32, #tpu.memory_space<vmem>>, vector<1x2x4xf32>,
    } else {
    }
    return
  }
  func.func @transform_0(%arg0: i32, %arg1: i32) -> (i32, i32, i32) {
    %c1_i32 = arith.constant 1 : i32
    %0 = arith.muli %arg0, %c1_i32 : i32
    %1 = arith.addi %0, %arg1 : i32
    %c0_i32 = arith.constant 0 : i32
    %2 = arith.minsi %1, %c0_i32 : i32
    %c0_i32_0 = arith.constant 0 : i32
    %c0_i32_1 = arith.constant 0 : i32
    %c0_i32_2 = arith.constant 0 : i32
    return %c0_i32_0, %c0_i32_1, %2 : i32, i32, i32
  }
  func.func @transform_1(%arg0: i32, %arg1: i32) -> (i32, i32) {
    %c1_i32 = arith.constant 1 : i32
    %0 = arith.muli %arg0, %c1_i32 : i32
    %1 = arith.addi %0, %arg1 : i32
    %c0_i32 = arith.constant 0 : i32
    %2 = arith.minsi %1, %c0_i32 : i32
    %c0_i32_0 = arith.constant 0 : i32
    %c0_i32_1 = arith.constant 0 : i32
    return %c0_i32_0, %2 : i32, i32
  }
  func.func @transform_2(%arg0: i32, %arg1: i32) -> (i32, i32, i32) {
    %c0_i32 = arith.constant 0 : i32
    %c0_i32_0 = arith.constant 0 : i32
    %c0_i32_1 = arith.constant 0 : i32
    return %arg0, %c0_i32, %c0_i32_0 : i32, i32, i32
  }
  func.func @transform_3(%arg0: i32, %arg1: i32) -> (i32, i32, i32) {
    %c0_i32 = arith.constant 0 : i32
    %c0_i32_0 = arith.constant 0 : i32
    %c0_i32_1 = arith.constant 0 : i32
    return %arg0, %c0_i32, %c0_i32_0 : i32, i32, i32
  }
}

</mosaic_0001>

<bundles_post_ra>
// kernel: multi_class_dice_loss.1
= control target key start
LH: loop header
LB: loop body
LE: loop exit
PB: predicated region body
PF: predicated region fallthrough
CT: control target
= control target key end

     0   :  { %s786_s12 = smov 0   ;;  %s788_s13 = smov 0   ;;  %s924_s0 = inlined_call_operand.vmem [shape: f32[2,4,256], index: 0, kind: input, shape index: {}]   ;;  %s925_s1 = inlined_call_operand.vmem [shape: s32[2,256], index: 1, kind: input, shape index: {}]   ;;  %s926_s2 = inlined_call_operand.vmem [shape: f32[2,2,4], index: 2, kind: output, shape index: {0}]   ;;  %s927_s3 = inlined_call_operand.vmem [shape: f32[2,2,4], index: 3, kind: output, shape index: {1}]  }
   0x1   :  { %s790_s14 = smov 0  }
   0x2 LB: > { %s26_s15 = sadd.s32 1, %s759_s13  ;;  %p685_p0 = scmp.ge.s32.totalorder %s763_s14, 1  ;;  %s763_s14 = sphi %s790_s14, %s14_s14   ;;  %s759_s13 = sphi %s788_s13, %s929_s13   ;;  %s755_s12 = sphi %s786_s12, %s928_s12  }
   0x3   : > { %p28_p1 = scmp.ge.s32.totalorder %s26_s15, 2  ;;  %p188_p2 = scmp.lt.s32.totalorder %s763_s14, 3 }
   0x5   : > { %s931_s15 = smov (%p28_p1, %s26_s15), 0  ;;  %p189_p3 = pnand %p685_p0, %p188_p2 }
   0x6   : > { %p227_p4 = scmp.lt.s32.totalorder (!%p189_p3), %s755_s12, 0  ;;  %p250_p5 = scmp.lt.s32.totalorder (!%p189_p3), %s755_s12, 1  ;;  %v366_v0 = vlaneseq (!%p189_p3)  ;;  %vm262_vm0 = vcmask (!%p189_p3), 25600   ;;  %v765_v2 = vmov (!%p189_p3), 0.0   ;;  %vm275_vm1 = vcmask (!%p189_p3), 1043456  }
   0x7   : > { %192 = sbr.rel (%p189_p3) target bundleno = 409 (0x199), region = 28  ;;  %p697_p7 = scmp.ge.s32.totalorder (!%p189_p3), %s755_s12, 1 }
   0x8   : > { %v813_v1 = vshrl.u32 (!%p189_p3), %v366_v0, 7 }
   0xa   : > { %v378_v3 = vsub.s32 (!%p189_p3), 0, %v813_v1  ;;  %v382_v4 = vsub.s32 (!%p189_p3), 1, %v813_v1 }
   0xe   : > { %s228_s16 = scalar_select %p227_p4, %s755_s12, 0 }
   0xf   : > { %s251_s17 = scalar_select %p250_p5, %s755_s12, 1 }
  0x10   : > { %s686_s18 = sshll.u32 %s228_s16, 1  ;;  %vm447_vm6 = vcmask (!%p697_p7), 1041409  }
  0x11   : > { %p230_p6 = scmp.lt.s32.totalorder %s686_s18, 1  ;;  %s690_s19 = sshll.u32 %s251_s17, 1 }
  0x12   : > { %s818_s22 = scalar_lea.vmem %s926_s2, %s690_s19  ;;  %s823_s25 = scalar_lea.vmem %s927_s3, %s690_s19 }
  0x13   : > { %s933_s18 = smov (!%p230_p6, %s686_s18), 1  ;;  %263 = vst.msk [vmem:[%s818_s22] sm:$0x3] %vm262_vm0, %v765_v2  ;;  %264 = vst.msk [vmem:[%s823_s25] sm:$0x3] %vm262_vm0, %v765_v2 }
  0x14   : > { %s687_s26 = sshll.u32 %s933_s18, 2  ;;  %s689_s27 = sshll.u32 %s933_s18, 1 }
  0x15   : > { %s233_s30 = scalar_lea.vmem %s924_s0, %s687_s26  ;;  %s245_s6 = scalar_lea.vmem %s925_s1, %s689_s27 }
  0x16   : > { %v266_v5 = vld [vmem:[%s233_s30] sm:$0xff]  ;;  %v267_v6 = vld [vmem:[%s233_s30 + $0x8] sm:$0xff] }
  0x17   : > { %v692_v7 = vld.sshfl [vmem:[%s245_s6] sm:$0x33 pattern:$0x75316420]  ;;  %v271_v8 = vcombine.high %v266_v5, %v266_v5  ;;  %v272_v9 = vcombine.high %v267_v6, %v267_v6  ;;  %v276_v10 = vsel %vm275_vm1, %v266_v5, -inf  ;;  %v290_v11 = vsel %vm275_vm1, %v267_v6, -inf }
  0x18   : > { %v277_v12 = vrot.slane %v276_v10, 4  ;;  %v291_v13 = vrot.slane %v290_v11, 4  ;;  %v375_v14 = vcombine.high %v692_v7, %v692_v7  ;;  %v379_v15 = vrot.slane %v692_v7, %v378_v3 }
  0x19   : > { %v283_v16 = vsel %vm275_vm1, %v271_v8, -inf  ;;  %v297_v17 = vsel %vm275_vm1, %v272_v9, -inf  ;;  %v383_v18 = vrot.slane %v692_v7, %v382_v4 }
  0x1a   : > { %v278_v19 = vmax.f32 %v276_v10, %v277_v12  ;;  %v284_v20 = vrot.slane %v283_v16, 4  ;;  %v292_v21 = vmax.f32 %v290_v11, %v291_v13  ;;  %v298_v22 = vrot.slane %v297_v17, 4 }
  0x1b   : > { %v387_v23 = vrot.slane %v375_v14, %v378_v3  ;;  %v391_v24 = vrot.slane %v375_v14, %v382_v4  ;;  %vm392_vm2 = vcmp.eq.s32.totalorder %v379_v15, %v813_v1  ;;  %vm393_vm3 = vcmp.eq.s32.totalorder %v383_v18, %v813_v1 }
  0x1c   : > { %v279_v25 = vrot.slane %v278_v19, 2  ;;  %v285_v26 = vmax.f32 %v283_v16, %v284_v20  ;;  %v293_v27 = vrot.slane %v292_v21, 2  ;;  %v299_v28 = vmax.f32 %v297_v17, %v298_v22 }
  0x1d   : > { %vm394_vm4 = vcmp.eq.s32.totalorder %v387_v23, %v813_v1  ;;  %vm395_vm5 = vcmp.eq.s32.totalorder %v391_v24, %v813_v1  ;;  %v845_v29 = vsel %vm392_vm2, 1.0, %v765_v2  ;;  %v847_v30 = vsel %vm393_vm3, 1.0, %v765_v2 }
  0x1e   : > { %v280_v31 = vmax.f32 %v278_v19, %v279_v25  ;;  %v286_v32 = vrot.slane %v285_v26, 2  ;;  %v294_v33 = vmax.f32 %v292_v21, %v293_v27  ;;  %v300_v34 = vrot.slane %v299_v28, 2 }
  0x1f   : > { %v849_v35 = vsel %vm394_vm4, 1.0, %v765_v2  ;;  %v851_v36 = vsel %vm395_vm5, 1.0, %v765_v2 }
  0x20   : > { %v281_v37 = vrot.slane %v280_v31, 1  ;;  %v287_v38 = vmax.f32 %v285_v26, %v286_v32  ;;  %v295_v39 = vrot.slane %v294_v33, 1  ;;  %v301_v40 = vmax.f32 %v299_v28, %v300_v34 }
  0x21   : > { %v414_v34 = vcombine.low (!%p697_p7), %v849_v35, %v851_v36 }
  0x22   : > { %v282_v41 = vmax.f32 %v280_v31, %v281_v37  ;;  %v288_v42 = vrot.slane %v287_v38, 1  ;;  %v296_v43 = vmax.f32 %v294_v33, %v295_v39  ;;  %v302_v44 = vrot.slane %v301_v40, 1 }
  0x23   : > { %v413_v33 = vcombine.low (!%p697_p7), %v845_v29, %v847_v30 }
  0x24   : > { %v289_v45 = vmax.f32 %v287_v38, %v288_v42  ;;  %v303_v46 = vmax.f32 %v301_v40, %v302_v44 }
  0x26   : > { %v308_v47 = vcombine.low %v282_v41, %v289_v45  ;;  %v309_v48 = vcombine.low %v296_v43, %v303_v46 }
  0x28   : > { %v312_v49 = vsub.f32 %v266_v5, %v308_v47  ;;  %v313_v50 = vsub.f32 %v267_v6, %v309_v48 }
  0x2a   : > { %v314_v51 = vmul.f32 1.442695, %v312_v49  ;;  %v316_v52 = vmul.f32 1.442695, %v313_v50 }
  0x2c   : > { %729 = vpow2.f32 %v314_v51 }
  0x2d   : > { %731 = vpow2.f32 %v316_v52 }
  0x36   : > { %v730_v53 = vpop.eup %729 }
  0x37   : > { %v732_v54 = vpop.eup %731  ;;  %v320_v55 = vcombine.high %v730_v53, %v730_v53  ;;  %v324_v56 = vsel %vm275_vm1, %v730_v53, 0.0 }
  0x38   : > { %v321_v57 = vcombine.high %v732_v54, %v732_v54  ;;  %v325_v58 = vrot.slane %v324_v56, 4  ;;  %v338_v59 = vsel %vm275_vm1, %v732_v54, 0.0 }
  0x39   : > { %v331_v60 = vsel %vm275_vm1, %v320_v55, 0.0  ;;  %v339_v61 = vrot.slane %v338_v59, 4 }
  0x3a   : > { %v326_v62 = vadd.f32 %v325_v58, %v324_v56  ;;  %v332_v63 = vrot.slane %v331_v60, 4  ;;  %v345_v2 = vsel %vm275_vm1, %v321_v57, 0.0  ;;  %v438_v57 = vand.u32 (!%p697_p7), 127, %v366_v0 }
  0x3b   : > { %v340_v3 = vadd.f32 %v339_v61, %v338_v59  ;;  %v346_v4 = vrot.slane %v345_v2, 4 }
  0x3c   : > { %v327_v5 = vrot.slane %v326_v62, 2  ;;  %v333_v6 = vadd.f32 %v332_v63, %v331_v60  ;;  %v441_v60 = vsub.s32 (!%p697_p7), %v438_v57, %v813_v1 }
  0x3d   : > { %v341_v7 = vrot.slane %v340_v3, 2  ;;  %v347_v8 = vadd.f32 %v346_v4, %v345_v2 }
  0x3e   : > { %v328_v9 = vadd.f32 %v327_v5, %v326_v62  ;;  %v334_v10 = vrot.slane %v333_v6, 2  ;;  %v408_v5 = vld [vmem:[%s818_s22] sm:$0x3] (!%p697_p7) }
  0x3f   : > { %v342_v11 = vadd.f32 %v341_v7, %v340_v3  ;;  %v348_v12 = vrot.slane %v347_v8, 2  ;;  %v453_v3 = vld [vmem:[%s823_s25] sm:$0x3] (!%p697_p7) }
  0x40   : > { %v329_v13 = vrot.slane %v328_v9, 1  ;;  %v335_v14 = vadd.f32 %v334_v10, %v333_v6 }
  0x41   : > { %v343_v15 = vrot.slane %v342_v11, 1  ;;  %v349_v16 = vadd.f32 %v348_v12, %v347_v8 }
  0x42   : > { %v330_v17 = vadd.f32 %v329_v13, %v328_v9  ;;  %v336_v18 = vrot.slane %v335_v14, 1 }
  0x43   : > { %v344_v19 = vadd.f32 %v343_v15, %v342_v11  ;;  %v350_v20 = vrot.slane %v349_v16, 1 }
  0x44   : > { %v337_v21 = vadd.f32 %v336_v18, %v335_v14  ;;  %733 = vrcp.f32 %v330_v17 }
  0x45   : > { %v351_v22 = vadd.f32 %v350_v20, %v349_v16  ;;  %735 = vrcp.f32 %v344_v19 }
  0x46   : > { %737 = vrcp.f32 %v337_v21 }
  0x47   : > { %739 = vrcp.f32 %v351_v22 }
  0x4e   : > { %v734_v23 = vpop.eup %733  ;;  %407 = sbr.rel (%p697_p7) target bundleno = 244 (0xf4), region = 36 }
  0x4f   : > { %v736_v24 = vpop.eup %735 }
  0x50   : > { %v738_v25 = vpop.eup %737 }
  0x51   : > { %v740_v26 = vpop.eup %739  ;;  %v360_v27 = vcombine.low %v734_v23, %v738_v25 }
  0x52   : > { %v361_v28 = vcombine.low %v736_v24, %v740_v26 }
  0x53   : > { %v857_v31 = vmul.f32 %v730_v53, %v360_v27 }
  0x54   : > { %v859_v32 = vmul.f32 %v732_v54, %v361_v28 }
  0x55   : > { %v454_v37 = vadd.f32 %v413_v33, %v857_v31  ;;  %v417_v38 = vmul.f32 %v413_v33, %v857_v31 }
  0x56   : > { %v455_v39 = vadd.f32 %v414_v34, %v859_v32  ;;  %v418_v40 = vmul.f32 %v414_v34, %v859_v32 }
  0x57   : > { %v458_v41 = vcombine.high %v454_v37, %v454_v37  ;;  %v462_v42 = vsel %vm275_vm1, %v454_v37, 0.0  ;;  %v421_v43 = vcombine.high %v417_v38, %v417_v38  ;;  %v425_v44 = vsel %vm275_vm1, %v417_v38, 0.0 }
  0x58   : > { %v459_v45 = vcombine.high %v455_v39, %v455_v39  ;;  %v422_v46 = vcombine.high %v418_v40, %v418_v40  ;;  %v467_v49 = vsel %vm275_vm1, %v455_v39, 0.0  ;;  %v430_v50 = vsel %vm275_vm1, %v418_v40, 0.0 }
  0x59   : > { %v463_v47 = vsel %vm275_vm1, %v458_v41, 0.0  ;;  %v426_v48 = vsel %vm275_vm1, %v421_v43, 0.0 }
  0x5a   : > { %v464_v51 = vadd.f32 %v463_v47, %v462_v42  ;;  %v427_v52 = vadd.f32 %v426_v48, %v425_v44  ;;  %v468_v53 = vsel %vm275_vm1, %v459_v45, 0.0  ;;  %v431_v54 = vsel %vm275_vm1, %v422_v46, 0.0 }
  0x5b   : > { %v469_v55 = vadd.f32 %v468_v53, %v467_v49  ;;  %v432_v56 = vadd.f32 %v431_v54, %v430_v50 }
  0x5c   : > { %465 = vadd.xlane.f32.xlu1 %v464_v51  ;;  %428 = vadd.xlane.f32.xlu0 %v427_v52 }
  0x60   : > { %470 = vadd.xlane.f32.xlu1 %v469_v55  ;;  %433 = vadd.xlane.f32.xlu0 %v432_v56 }
  0xe9   : > { %v466_v58 = vpop.xlane.xlu1 %465  ;;  %v429_v59 = vpop.xlane.xlu0 %428 }
  0xea   : > { %v477_v63 = vrot.slane %v466_v58, %v441_v60  ;;  %v442_v2 = vrot.slane %v429_v59, %v441_v60 }
  0xed   : > { %v471_v61 = vpop.xlane.xlu1 %470  ;;  %v434_v62 = vpop.xlane.xlu0 %433 }
  0xee   : > { %v481_v4 = vrot.slane %v471_v61, %v441_v60  ;;  %v446_v6 = vrot.slane %v434_v62, %v441_v60 }
  0xf0   : > { %v482_v7 = vsel %vm447_vm6, %v481_v4, %v477_v63  ;;  %v448_v8 = vsel %vm447_vm6, %v446_v6, %v442_v2 }
  0xf1   : > { %v484_v9 = vadd.f32 %v482_v7, %v453_v3  ;;  %v450_v10 = vadd.f32 %v448_v8, %v408_v5 }
  0xf3   : > { %485 = vst.msk [vmem:[%s823_s25] sm:$0x3] %vm262_vm0, %v484_v9  ;;  %452 = vst.msk [vmem:[%s818_s22] sm:$0x3] %vm262_vm0, %v450_v10 }
  0xf4 PF: > { %489 = sbr.rel (%p250_p5) target bundleno = 409 (0x199), region = 40  ;;  %v491_v11 = vand.u32 (!%p250_p5), 127, %v366_v0  ;;  %s699_s7 = sshll.u32 (!%p250_p5), %s755_s12, 8  ;;  %v505_v15 = vcombine.high (!%p250_p5), %v857_v31, %v857_v31  ;;  %v506_v16 = vcombine.high (!%p250_p5), %v859_v32, %v859_v32  ;;  %vm542_vm9 = vcmask (!%p250_p5), 1041409  }
  0xf5   : > { %v494_v12 = vstv (!%p250_p5), %s699_s7 }
  0xf6   : > { %v492_v13 = vadd.s32 (!%p250_p5), 128, %v491_v11  ;;  %v495_v14 = vadd.s32 (!%p250_p5), %v494_v12, %v491_v11  ;;  %v536_v47 = vsub.s32 (!%p250_p5), %v491_v11, %v813_v1 }
  0xf8   : > { %v496_v17 = vadd.s32 (!%p250_p5), %v494_v12, %v492_v13  ;;  %vm497_vm7 = vcmp.lt.s32.totalorder (!%p250_p5), %v495_v14, 256 }
  0xf9   : > { %v509_v18 = vsel (!%p250_p5), %vm497_vm7, %v857_v31, 0.0  ;;  %v513_v19 = vsel (!%p250_p5), %vm497_vm7, %v845_v29, 0.0  ;;  %v511_v20 = vsel (!%p250_p5), %vm497_vm7, %v859_v32, 0.0  ;;  %v515_v0 = vsel (!%p250_p5), %vm497_vm7, %v849_v35, 0.0 }
  0xfa   : > { %vm498_vm8 = vcmp.lt.s32.totalorder (!%p250_p5), %v496_v17, 256  ;;  %v549_v21 = vadd.f32 (!%p250_p5), %v513_v19, %v509_v18  ;;  %v518_v22 = vmul.f32 (!%p250_p5), %v513_v19, %v509_v18  ;;  %v551_v23 = vadd.f32 (!%p250_p5), %v515_v0, %v511_v20  ;;  %v548_v52 = vld [vmem:[%s823_s25] sm:$0x3] (!%p250_p5) }
  0xfb   : > { %v510_v24 = vsel %vm498_vm8, %v505_v15, 0.0  ;;  %v514_v25 = vsel %vm498_vm8, %v847_v30, 0.0  ;;  %v512_v26 = vsel %vm498_vm8, %v506_v16, 0.0  ;;  %v516_v27 = vsel %vm498_vm8, %v851_v36, 0.0  ;;  %v517_v54 = vld [vmem:[%s818_s22] sm:$0x3] }
  0xfc   : > { %v550_v28 = vadd.f32 %v514_v25, %v510_v24  ;;  %v553_v33 = vsel %vm275_vm1, %v549_v21, 0.0  ;;  %v519_v31 = vmul.f32 %v514_v25, %v510_v24  ;;  %v522_v29 = vsel %vm275_vm1, %v518_v22, 0.0 }
  0xfd   : > { %v552_v34 = vadd.f32 %v516_v27, %v512_v26  ;;  %v520_v32 = vmul.f32 %v515_v0, %v511_v20  ;;  %v521_v37 = vmul.f32 %v516_v27, %v512_v26  ;;  %v558_v39 = vsel %vm275_vm1, %v551_v23, 0.0 }
  0xfe   : > { %v554_v35 = vsel %vm275_vm1, %v550_v28, 0.0  ;;  %v523_v38 = vsel %vm275_vm1, %v519_v31, 0.0 }
  0xff   : > { %v555_v40 = vadd.f32 %v554_v35, %v553_v33  ;;  %v524_v30 = vadd.f32 %v523_v38, %v522_v29  ;;  %v559_v41 = vsel %vm275_vm1, %v552_v34, 0.0  ;;  %v527_v36 = vsel %vm275_vm1, %v520_v32, 0.0 }
 0x100   : > { %v528_v42 = vsel %vm275_vm1, %v521_v37, 0.0  ;;  %v560_v43 = vadd.f32 %v559_v41, %v558_v39 }
 0x101   : > { %556 = vadd.xlane.f32.xlu1 %v555_v40  ;;  %525 = vadd.xlane.f32.xlu0 %v524_v30  ;;  %v529_v44 = vadd.f32 %v528_v42, %v527_v36 }
 0x105   : > { %561 = vadd.xlane.f32.xlu1 %v560_v43  ;;  %530 = vadd.xlane.f32.xlu0 %v529_v44 }
 0x18e   : > { %v557_v45 = vpop.xlane.xlu1 %556  ;;  %v526_v46 = vpop.xlane.xlu0 %525 }
 0x18f   : > { %v568_v50 = vrot.slane %v557_v45, %v536_v47  ;;  %v537_v51 = vrot.slane %v526_v46, %v536_v47 }
 0x192   : > { %v562_v48 = vpop.xlane.xlu1 %561  ;;  %v531_v49 = vpop.xlane.xlu0 %530 }
 0x193   : > { %v572_v53 = vrot.slane %v562_v48, %v536_v47  ;;  %v541_v55 = vrot.slane %v531_v49, %v536_v47 }
 0x195   : > { %v573_v56 = vsel %vm542_vm9, %v572_v53, %v568_v50  ;;  %v543_v57 = vsel %vm542_vm9, %v541_v55, %v537_v51 }
 0x196   : > { %v575_v58 = vadd.f32 %v573_v56, %v548_v52  ;;  %v545_v59 = vadd.f32 %v543_v57, %v517_v54 }
 0x198   : > { %576 = vst.msk [vmem:[%s823_s25] sm:$0x3] %vm262_vm0, %v575_v58  ;;  %547 = vst.msk [vmem:[%s818_s22] sm:$0x3] %vm262_vm0, %v545_v59 }
 0x199 PF: > { %s14_s14 = sadd.s32 1, %s763_s14   ;;  %s928_s12 = smov %s759_s13 }
 0x19a   : > { %p11_p8 = scmp.ge.s32.totalorder %s14_s14, 4   ;;  %s929_s13 = smov %s931_s15 }
 0x19c   :  { %13 = sbr.rel (!%p11_p8) target bundleno = 2 (0x2), region = 85 }

</bundles_post_ra>
